<compile_context>
chip_gen: v7x
topology: tpu7x:2x2x1
jax: 0.10.0
libtpu: 0.0.40
codegen_flags: <defaults>
</compile_context>

<pallas_src>
import math

import jax
import jax.numpy as jnp
from jax import lax
from jax.experimental import pallas as pl
from jax.experimental.pallas import tpu as pltpu


# ----------------------------------------------------------------------------
# Fixed sinusoidal table (identical math to FixedEmbedding.__init__)
# ----------------------------------------------------------------------------
def fixed_embedding_table(c_in: int, d_model: int) -> jnp.ndarray:
    position = jnp.arange(c_in, dtype=jnp.float32)[:, None]            # (c_in, 1)
    div_term = jnp.exp(
        jnp.arange(0, d_model, 2, dtype=jnp.float32)
        * (-(math.log(10000.0) / d_model))
    )                                                                   # (d_model//2,)
    angles = position * div_term[None, :]                               # (c_in, d_model//2)
    w = jnp.zeros((c_in, d_model), jnp.float32)
    w = w.at[:, 0::2].set(jnp.sin(angles))
    w = w.at[:, 1::2].set(jnp.cos(angles))
    return w


# ----------------------------------------------------------------------------
# Kernel: gather a block of token embeddings via one-hot @ table on the MXU
# ----------------------------------------------------------------------------
def _embedding_gather_kernel(idx_ref, table_ref, out_ref):
    idx = idx_ref[...]                                  # (tn, 1) int32
    tn = idx.shape[0]
    c_in_pad = table_ref.shape[0]                       # multiple of 128 (lane-dense)
    # one-hot rows: (tn, c_in_pad) built with a 2-D iota + compare (VPU work)
    onehot = (idx == lax.broadcasted_iota(jnp.int32, (tn, c_in_pad), 1)).astype(
        jnp.float32
    )
    # exact row selection: contract on c_in_pad; HIGHEST keeps f32 values exact
    out_ref[...] = lax.dot_general(
        onehot,
        table_ref[...],
        dimension_numbers=(((1,), (0,)), ((), ())),
        precision=lax.Precision.HIGHEST,
        preferred_element_type=jnp.float32,
    )


def _round_up(x: int, m: int) -> int:
    return ((x + m - 1) // m) * m


def fixed_embedding(x, table, *, block_tokens: int = 512):
    """x: integer indices of any shape (values in [0, c_in)).
    table: (c_in, d_model) f32 fixed sinusoidal table.
    Returns x.shape + (d_model,) float32 (gradient-stopped, like .detach()).
    For best store bandwidth use d_model that is a multiple of 128."""
    c_in, d_model = table.shape
    orig_shape = x.shape
    n = int(x.size)

    idx2d = x.reshape(n, 1).astype(jnp.int32)

    # Pad the contraction dim (vocab) to a full lane width so the one-hot
    # compare and the MXU pass are lane-dense and unmasked. Padded rows are
    # zero and are never selected (indices < c_in).
    c_in_pad = _round_up(c_in, 128)
    if c_in_pad != c_in:
        table = jnp.pad(table, ((0, c_in_pad - c_in), (0, 0)))

    # Token tile: sublane-aligned, large by default to amortize grid overhead,
    # but never larger than needed for this call.
    tn = min(_round_up(block_tokens, 8), _round_up(max(n, 1), 8))
    grid = (pl.cdiv(n, tn),)   # partial final block is masked by Pallas

    out = pl.pallas_call(
        _embedding_gather_kernel,
        out_shape=jax.ShapeDtypeStruct((n, d_model), jnp.float32),
        grid=grid,
        in_specs=[
            pl.BlockSpec((tn, 1), lambda i: (i, 0)),              # token indices block
            pl.BlockSpec((c_in_pad, d_model), lambda i: (0, 0)),  # table, VMEM-resident
        ],
        out_specs=pl.BlockSpec((tn, d_model), lambda i: (i, 0)),
        compiler_params=pltpu.CompilerParams(
            dimension_semantics=("parallel",),   # shard token blocks across TCs (v7x)
        ),
    )(idx2d, table)

    out = out.reshape(*orig_shape, d_model)      # metadata-only reshape
    return lax.stop_gradient(out)                # mirrors .detach()


if __name__ == "__main__":
    B, L = 2, 8              # batch, sequence of integer positions
    c_in, d_model = 24, 128  # e.g. hour-of-day temporal embedding, lane-dense width

    key = jax.random.PRNGKey(0)
    x = jax.random.randint(key, (B, L), 0, c_in, dtype=jnp.int32)

    table = fixed_embedding_table(c_in, d_model)
    # small block_tokens so the demo exercises a multi-step (2-step) grid,
    # which also gives both v7x TensorCores a block each
    out = fixed_embedding(x, table, block_tokens=8)
    jax.block_until_ready(out)

    assert out.shape == (B, L, d_model)
    ref = table[x]  # pure-JAX reference lookup
    assert jnp.allclose(out, ref, atol=1e-6, rtol=0.0), float(
        jnp.max(jnp.abs(out - ref))
    )
    print("KERNEL_OK")
</pallas_src>

<mosaic_0001>
module attributes {stable_mosaic.version = 11 : i64} {
  func.func @_embedding_gather_kernel(%arg0: i32, %arg1: memref<8x1xi32, #tpu.memory_space<vmem>>, %arg2: memref<128x128xf32, #tpu.memory_space<vmem>>, %arg3: memref<8x128xf32, #tpu.memory_space<vmem>>) attributes {dimension_semantics = [#tpu.dimension_semantics<parallel>], iteration_bounds = array<i64: 2>, scalar_prefetch = 0 : i64, scratch_operands = 0 : i64, tpu.core_type = #tpu.core_type<tc>, window_params = [{transform_indices = @transform_0, window_bounds = array<i64: 8, 1>}, {pipeline_mode = #tpu.pipeline_mode<synchronous>, transform_indices = @transform_1, window_bounds = array<i64: 128, 128>}, {transform_indices = @transform_2, window_bounds = array<i64: 8, 128>}]} {
    %c0 = arith.constant 0 : index
    %c0_0 = arith.constant 0 : index
    %0 = vector.load %arg1[%c0, %c0_0] : memref<8x1xi32, #tpu.memory_space<vmem>>, vector<8x1xi32>
    %1 = tpu.iota {dimensions = array<i32: 1>} : vector<8x128xi32>
    %2 = vector.broadcast %0 : vector<8x1xi32> to vector<8x128xi32>
    %3 = arith.cmpi eq, %2, %1 : vector<8x128xi32>
    %4 = arith.extui %3 : vector<8x128xi1> to vector<8x128xi32>
    %5 = arith.sitofp %4 : vector<8x128xi32> to vector<8x128xf32>
    %c0_1 = arith.constant 0 : index
    %c0_2 = arith.constant 0 : index
    %6 = vector.load %arg2[%c0_1, %c0_2] : memref<128x128xf32, #tpu.memory_space<vmem>>, vector<128x128xf32>
    %cst = arith.constant dense<0.000000e+00> : vector<8x128xf32>
    %7 = tpu.matmul %5, %6, %cst {dimension_numbers = #tpu.dot_dimension_numbers<[1], [0], [0], [1], [0, 0, 1, 1], [], []>, precision = #tpu.contract_precision<fp32>} : vector<8x128xf32>, vector<128x128xf32>, vector<8x128xf32> -> vector<8x128xf32>
    %c0_3 = arith.constant 0 : index
    %c0_4 = arith.constant 0 : index
    %8 = vector.load %arg3[%c0_3, %c0_4] : memref<8x128xf32, #tpu.memory_space<vmem>>, vector<8x128xf32>
    tpu.vector_store %arg3[%c0_3, %c0_4], %7 {strides = array<i32>} : memref<8x128xf32, #tpu.memory_space<vmem>>, vector<8x128xf32>,
    return
  }
  func.func @transform_0(%arg0: i32) -> (i32, i32) {
    %c0_i32 = arith.constant 0 : i32
    %c0_i32_0 = arith.constant 0 : i32
    return %arg0, %c0_i32 : i32, i32
  }
  func.func @transform_1(%arg0: i32) -> (i32, i32) {
    %c0_i32 = arith.constant 0 : i32
    %c0_i32_0 = arith.constant 0 : i32
    %c0_i32_1 = arith.constant 0 : i32
    return %c0_i32, %c0_i32_0 : i32, i32
  }
  func.func @transform_2(%arg0: i32) -> (i32, i32) {
    %c0_i32 = arith.constant 0 : i32
    %c0_i32_0 = arith.constant 0 : i32
    return %arg0, %c0_i32 : i32, i32
  }
}

</mosaic_0001>

<bundles_post_ra>
// kernel: tpu_custom_call.1
= control target key start
LH: loop header
LB: loop body
LE: loop exit
PB: predicated region body
PF: predicated region fallthrough
CT: control target
= control target key end

     0   :  { %7 = vsyncpa [#allocation3], 0  ;;  %s2014_s0 = inlined_call_operand.vmem [shape: s32[16,1], index: 0, kind: input, shape index: {}]   ;;  %s2015_s1 = inlined_call_operand.hbm [shape: f32[128,128], index: 1, kind: input, shape index: {}]   ;;  %s2016_s2 = inlined_call_operand.hbm [shape: f32[16,128], index: 2, kind: output, shape index: {}]  }
   0x1   :  { %8 = vsyncpa [#allocation4], 0 }
   0x2   :  { %10 = vsyncpa [#allocation4 + $0x1], 0  ;;  %s1565_s9 = smov 0   ;;  %s1567_s10 = smov 0  }
   0x3   :  { %s1569_s11 = smov 0   ;;  %s1571_s12 = smov 0  }
   0x4 LB: > { %s1586_s13 = sadd.s32 4294967295, %s1539_s12   ;;  %s906_s14 = sadd.s32 4294967294, %s1539_s12   ;;  %s1539_s12 = sphi %s1571_s12, %s2032_s12   ;;  %s1535_s11 = sphi %s1569_s11, %s2031_s11   ;;  %s1531_s10 = sphi %s1567_s10, %s2030_s10   ;;  %s1527_s9 = sphi %s1565_s9, %s2029_s9  }
   0x5   : > { %s1590_s15 = sadd.s32 1, %s1539_s12   ;;  %s70_s16 = sadd.s32 1, %s1535_s11 }
   0x6   : > { %s67_s17 = ssub.s32 %s1539_s12, %s1590_s15  ;;  %p80_p0 = scmp.ne.s32.totalorder %s1535_s11, %s1531_s10 }
   0x7   : > { %p68_p1 = scmp.eq.s32.totalorder %s67_s17, 0  ;;  %p81_p2 = scmp.eq.s32.totalorder %s1586_s13, 1 }
   0x8   : > { %p86_p3 = scmp.ne.s32.totalorder %s1531_s10, %s1527_s9  ;;  %p87_p4 = scmp.eq.s32.totalorder %s906_s14, 1 }
   0x9   : > { %s1601_s18 = scalar_select %p68_p1, %s1535_s11, %s70_s16  }
   0xa   : > { %p1603_p5 = por %p81_p2, %p80_p0  ;;  %p1607_p6 = por %p87_p4, %p86_p3 }
   0xb   : > { %p907_p7 = scmp.ge.s32.totalorder %s1539_s12, 1  ;;  %p94_p8 = scmp.lt.s32.totalorder %s1539_s12, 3 }
   0xc   : > { %s2020_s19 = scalar_select %p1603_p5, 1, 0 }
   0xd   : > { %s2021_s20 = scalar_select %p1607_p6, 1, 0 }
   0xe   : > { %p2017_p9 = scmp.eq.s32.totalorder %s1586_s13, 0  ;;  %p1614_p10 = pnand %p907_p7, %p94_p8 }
   0xf   : > { %s1541_s22 = smov [#allocation2]   ;;  %s1445_s27 = scalar_lea.hbm %s2015_s1, 2048 }
  0x10   : > { %s2022_s21 = scalar_select %p1614_p10, 1, 0 }
  0x11   : > { %s106_s23 = sshll.u32 %s1541_s22, 4  ;;  %p1393_p11 = pneg %p1614_p10  ;;  %s107_s23 = int_to_ptr.vmem [resolvable:$true] %s106_s23 }
  0x12   : > { %p1446_p13 = scmp.ne.s32.totalorder %s2015_s1, %s1445_s27  ;;  %p1452_p3 = scmp.lt.u32.totalorder %s1445_s27, %s2015_s1 }
  0x13   : > { %p1622_p12 = pnand %p2017_p9, %p1393_p11 }
  0x15   : > { %p1447_p0 = pneg %p1622_p12 }
  0x17   : > { %p1448_p1 = pnand %p1447_p0, %p1446_p13 }
  0x19   : > { %p1449_p2 = pneg %p1448_p1 }
  0x1b   : > { %p1454_p4 = pnand %p1452_p3, %p1449_p2 }
  0x1d   : > { %1457 = shalt.err (!%p1454_p4)
}
  0x1e   : > { %s1458_s4 = scalar_lea.vmem %s107_s23, 2048  ;;  %p1466_p9 = scmp.lt.s32.totalorder %s107_s23, %s107_s23 }
  0x1f   : > { %p1459_p7 = scmp.ne.s32.totalorder %s107_s23, %s1458_s4  ;;  %p1467_p6 = scmp.lt.s32.totalorder %s1458_s4, %s1458_s4 }
  0x21   : > { %p1461_p8 = pnand %p1459_p7, %p1447_p0  ;;  %p1468_p5 = por %p1467_p6, %p1466_p9 }
  0x23   : > { %p1462_p11 = pneg %p1461_p8 }
  0x25   : > { %p1469_p10 = pnand %p1468_p5, %p1462_p11 }
  0x27   : > { %1472 = shalt.err (!%p1469_p10)
}
  0x28   : > { %s1542_s5 = smov 128   ;;  %s1543_s6 = smov 8  }
  0x29   : > { %1396 = dma.hbm_to_vmem [thread:$0]  (!%p1622_p12), %s2015_s1, 2048, %s107_s23, [#allocation3], %s1542_s5, %s1542_s5, %s1543_s6  }
  0x2a   : > { %p2024_p13 = scmp.ne.s32.totalorder %s2022_s21, 0 }
  0x2b   : > { %p2025_p1 = scmp.eq.s32.totalorder (!%p2024_p13), %s1586_s13, 0 }
  0x2c   : > { %129 = sbr.rel (%p2024_p13) target bundleno = 489 (0x1e9), region = 28 }
  0x33   : > { %1518 = dma.done.wait (%p2025_p1), [#allocation3], 2048   ;;  %p2026_p0 = pmov %p2025_p1 }
  0x34   : > { %p150_p5 = scmp.lt.s32.totalorder %s1586_s13, 1  ;;  %v1544_v0 = vmov 0   ;;  %v1545_v1 = vmov 0.0|0.0   ;;  %v163_v3 = vld [vmem:[#allocation2] sm:$0xff]  ;;  %v164_v4 = vld [vmem:[#allocation2 + $0x8] sm:$0xff]  ;;  %v165_v7 = vld [vmem:[#allocation2 + $0x10] sm:$0xff] }
  0x35   : > { %1520 = vsyncadd (%p2026_p0), [#allocation3], 4294965248  ;;  %1444 = vset.pattern.permute.xlu0 %v1544_v0  ;;  %1306 = vmatprep.subr.bf16.mxu0 %v1545_v1  ;;  %v180_v5 = vand.u32 4294901760, %v163_v3  ;;  %v183_v6 = vand.u32 4294901760, %v164_v4  ;;  %v166_v8 = vld [vmem:[#allocation2 + $0x18] sm:$0xff]  ;;  %v167_v9 = vld [vmem:[#allocation2 + $0x20] sm:$0xff] }
  0x36   : > { %s151_s14 = scalar_select %p150_p5, %s1586_s13, 1  ;;  %1234 = vmatprep.subr.bf16.mxu1 %v1545_v1  ;;  %v186_v10 = vand.u32 4294901760, %v165_v7  ;;  %v189_v11 = vand.u32 4294901760, %v166_v8  ;;  %v168_v12 = vld [vmem:[#allocation2 + $0x28] sm:$0xff]  ;;  %v192_v13 = vand.u32 4294901760, %v167_v9  ;;  %v169_v14 = vld [vmem:[#allocation2 + $0x30] sm:$0xff] }
  0x37   : > { %v170_v15 = vld [vmem:[#allocation2 + $0x38] sm:$0xff]  ;;  %v1655_v16 = vpack.c.bf16 %v183_v6, %v180_v5  ;;  %v1657_v17 = vsub.f32 %v163_v3, %v180_v5  ;;  %v1659_v18 = vsub.f32 %v164_v4, %v183_v6  ;;  %v195_v19 = vand.u32 4294901760, %v168_v12  ;;  %v1661_v20 = vld [vmem:[#allocation2 + $0x40] sm:$0xff]  ;;  %v1663_v21 = vld [vmem:[#allocation2 + $0x48] sm:$0xff]  ;;  %s147_s23 = sand.u32 1, %s1531_s10   ;;  %s919_s25 = sshll.u32 %s1586_s13, 7 }
  0x38   : > { %s913_s16 = sshll.u32 %s151_s14, 3  ;;  %v1665_v22 = vld [vmem:[#allocation2 + $0x50] sm:$0xff]  ;;  %v1667_v23 = vsub.f32 %v165_v7, %v186_v10  ;;  %v1669_v24 = vsub.f32 %v166_v8, %v189_v11  ;;  %v1671_v25 = vsub.f32 %v167_v9, %v192_v13  ;;  %v1673_v26 = vld [vmem:[#allocation2 + $0x58] sm:$0xff]  ;;  %v1675_v27 = vld [vmem:[#allocation2 + $0x60] sm:$0xff]  ;;  %v1679_v28 = vpack.c.bf16 %v189_v11, %v186_v10  ;;  %s912_s24 = sshll.u32 %s147_s23, 3 }
  0x39   : > { %s153_s22 = scalar_lea.vmem %s2014_s0, %s913_s16  ;;  %1308 = vmatpush3.bf16.msra.mxu0 %v1655_v16  ;;  %1236 = vmatpush3.bf16.msra.mxu1 %v1655_v16  ;;  %v1681_v29 = vsub.f32 %v168_v12, %v195_v19  ;;  %v198_v30 = vand.u32 4294901760, %v169_v14  ;;  %v201_v31 = vand.u32 4294901760, %v170_v15  ;;  %v204_v32 = vand.u32 4294901760, %v1661_v20  ;;  %v1688_v35 = vld [vmem:[#allocation2 + $0x68] sm:$0xff]  ;;  %v1696_v40 = vld [vmem:[#allocation2 + $0x70] sm:$0xff]  ;;  %v1698_v41 = vld [vmem:[#allocation2 + $0x78] sm:$0xff]  ;;  %s1972_s30 = scalar_lea.hbm %s2016_s2, %s919_s25 }
  0x3a   : > { %v154_v2 = vld [vmem:[%s153_s22] sm:$0xff]  ;;  %1309 = vmatprep.subr.bf16.mxu0 %v1545_v1  ;;  %1237 = vmatprep.subr.bf16.mxu1 %v1545_v1  ;;  %v207_v33 = vand.u32 4294901760, %v1663_v21  ;;  %v210_v34 = vand.u32 4294901760, %v1665_v22  ;;  %v213_v38 = vand.u32 4294901760, %v1673_v26  ;;  %v216_v39 = vand.u32 4294901760, %v1675_v27  ;;  %s149_s26 = scalar_lea.vmem [#allocation5], %s912_s24 }
  0x3b   : > { %158 = vperm.xlu0 %1444, %v154_v2   ;;  %v1690_v36 = vsub.f32 %v169_v14, %v198_v30  ;;  %v1692_v37 = vsub.f32 %v170_v15, %v201_v31  ;;  %v1700_v42 = vpack.c.bf16 %v195_v19, %v192_v13  ;;  %v1703_v43 = vsub.f32 %v1661_v20, %v204_v32  ;;  %s835_s27 = sshll.u32 %s149_s26, 4  ;;  %s822_s3 = scalar_lea.sflag [#allocation4], %s147_s23  ;;  %s1974_s27 = int_to_ptr.vmem [resolvable:$true] %s835_s27 }
  0x3c   : > { %v1706_v44 = vsub.f32 %v1663_v21, %v207_v33  ;;  %v1713_v45 = vsub.f32 %v1665_v22, %v210_v34  ;;  %v1718_v46 = vsub.f32 %v1673_v26, %v213_v38  ;;  %v219_v47 = vand.u32 4294901760, %v1688_v35  ;;  %s1473_s4 = scalar_lea.vmem %s1974_s27, 128  ;;  %p2027_p9 = scmp.ne.s32.totalorder %s2020_s19, 0 }
  0x3d   : > { %1311 = vmatpush3.bf16.msra.mxu0 %v1679_v28  ;;  %1239 = vmatpush3.bf16.msra.mxu1 %v1679_v28  ;;  %v1724_v48 = vsub.f32 %v1675_v27, %v216_v39  ;;  %v222_v49 = vand.u32 4294901760, %v1696_v40  ;;  %v225_v50 = vand.u32 4294901760, %v1698_v41  ;;  %v273_v51 = vand.u32 4294901760, %v1657_v17  ;;  %p1474_p6 = scmp.ne.s32.totalorder %s1974_s27, %s1473_s4  ;;  %s1549_s13 = smov [#allocation5]  }
  0x3e   : > { %1312 = vmatprep.subr.bf16.mxu0 %v1545_v1  ;;  %1240 = vmatprep.subr.bf16.mxu1 %v1545_v1  ;;  %v1734_v52 = vsub.f32 %v1688_v35, %v219_v47  ;;  %vm1546_vm0 = vmmov 0   ;;  %v1547_v53 = vmov 0.0   ;;  %v280_v54 = vand.u32 4294901760, %v1659_v18  ;;  %s1477_s5 = sshll.u32 %s1549_s13, 4  ;;  %s1478_s5 = int_to_ptr.vmem [resolvable:$false] %s1477_s5 }
  0x3f   : > { %1161 = vmatprep.mubr.msk.f32.mxu0 %vm1546_vm0, %v1547_v53  ;;  %1056 = vmatprep.mubr.msk.f32.mxu1 %vm1546_vm0, %v1547_v53  ;;  %v287_v55 = vand.u32 4294901760, %v1667_v23  ;;  %v1742_v56 = vpack.c.bf16 %v201_v31, %v198_v30  ;;  %v1747_v57 = vsub.f32 %v1696_v40, %v222_v49  ;;  %v1752_v58 = vsub.f32 %v1698_v41, %v225_v50  ;;  %p1475_p10 = pnand %p1474_p6, %p2027_p9  ;;  %s1479_s6 = scalar_lea.vmem %s1478_s5, 256 }
  0x40   : > { %v274_v59 = vsub.f32 %v1657_v17, %v273_v51  ;;  %v1757_v60 = vpack.c.bf16 %v280_v54, %v273_v51  ;;  %v281_v61 = vsub.f32 %v1659_v18, %v280_v54  ;;  %v294_v62 = vand.u32 4294901760, %v1669_v24  ;;  %p1480_p2 = scmp.lt.s32.totalorder %s1974_s27, %s1478_s5  ;;  %p1481_p3 = scmp.lt.s32.totalorder %s1479_s6, %s1473_s4 }
  0x41   : > { %1314 = vmatpush3.bf16.msra.mxu0 %v1700_v42  ;;  %1242 = vmatpush3.bf16.msra.mxu1 %v1700_v42  ;;  %v288_v63 = vsub.f32 %v1667_v23, %v287_v55  ;;  %v301_v2 = vand.u32 4294901760, %v1671_v25  ;;  %v308_v3 = vand.u32 4294901760, %v1681_v29  ;;  %v315_v11 = vand.u32 4294901760, %v1690_v36  ;;  %p1476_p12 = pneg %p1475_p10 }
  0x42   : > { %1315 = vmatprep.subr.bf16.mxu0 %v1545_v1  ;;  %1243 = vmatprep.subr.bf16.mxu1 %v1545_v1  ;;  %v275_v0 = vand.u32 4294901760, %v274_v59  ;;  %v282_v4 = vand.u32 4294901760, %v281_v61  ;;  %v1766_v5 = vpack.c.bf16 %v294_v62, %v287_v55  ;;  %v295_v7 = vsub.f32 %v1669_v24, %v294_v62  ;;  %p1482_p4 = por %p1481_p3, %p1480_p2 }
  0x43   : > { %v289_v6 = vand.u32 4294901760, %v288_v63  ;;  %v1769_v8 = vpack.c.bf16 %v308_v3, %v301_v2  ;;  %v302_v9 = vsub.f32 %v1671_v25, %v301_v2  ;;  %v309_v10 = vsub.f32 %v1681_v29, %v308_v3 }
  0x44   : > { %v1776_v12 = vpack.c.bf16 %v207_v33, %v204_v32  ;;  %v1778_v13 = vpack.c.bf16 %v282_v4, %v275_v0  ;;  %v296_v14 = vand.u32 4294901760, %v295_v7  ;;  %v322_v15 = vand.u32 4294901760, %v1692_v37  ;;  %p1483_p7 = pnand %p1482_p4, %p1476_p12 }
  0x45   : > { %1317 = vmatpush3.bf16.msra.mxu0 %v1742_v56  ;;  %1245 = vmatpush3.bf16.msra.mxu1 %v1742_v56  ;;  %v303_v19 = vand.u32 4294901760, %v302_v9  ;;  %v310_v20 = vand.u32 4294901760, %v309_v10  ;;  %v316_v21 = vsub.f32 %v1690_v36, %v315_v11  ;;  %v329_v54 = vand.u32 4294901760, %v1703_v43 }
  0x46   : > { %1318 = vmatprep.subr.bf16.mxu0 %v1545_v1  ;;  %1246 = vmatprep.subr.bf16.mxu1 %v1545_v1  ;;  %v1784_v30 = vpack.c.bf16 %v296_v14, %v289_v6  ;;  %v1786_v31 = vpack.c.bf16 %v322_v15, %v315_v11  ;;  %v323_v32 = vsub.f32 %v1692_v37, %v322_v15  ;;  %v336_v55 = vand.u32 4294901760, %v1706_v44 }
  0x47   : > { %v1789_v33 = vpack.c.bf16 %v310_v20, %v303_v19  ;;  %v317_v51 = vand.u32 4294901760, %v316_v21  ;;  %v1799_v59 = vpack.c.bf16 %v213_v38, %v210_v34  ;;  %v330_v63 = vsub.f32 %v1703_v43, %v329_v54 }
  0x48   : > { %v324_v61 = vand.u32 4294901760, %v323_v32  ;;  %v1803_v62 = vpack.c.bf16 %v336_v55, %v329_v54  ;;  %v337_v0 = vsub.f32 %v1706_v44, %v336_v55  ;;  %v343_v22 = vand.u32 4294901760, %v1713_v45 }
  0x49   : > { %1320 = vmatpush3.bf16.msra.mxu0 %v1776_v12  ;;  %1248 = vmatpush3.bf16.msra.mxu1 %v1776_v12  ;;  %v331_v3 = vand.u32 4294901760, %v330_v63  ;;  %v350_v26 = vand.u32 4294901760, %v1718_v46  ;;  %v1817_v34 = vpack.c.bf16 %v219_v47, %v216_v39  ;;  %v357_v11 = vand.u32 4294901760, %v1724_v48 }
  0x4a   : > { %1321 = vmatprep.subr.bf16.mxu0 %v1545_v1  ;;  %1249 = vmatprep.subr.bf16.mxu1 %v1545_v1  ;;  %v1807_v2 = vpack.c.bf16 %v324_v61, %v317_v51  ;;  %v338_v4 = vand.u32 4294901760, %v337_v0  ;;  %v344_v7 = vsub.f32 %v1713_v45, %v343_v22  ;;  %v364_v27 = vand.u32 4294901760, %v1734_v52 }
  0x4b   : > { %v1823_v6 = vpack.c.bf16 %v350_v26, %v343_v22  ;;  %v351_v9 = vsub.f32 %v1718_v46, %v350_v26  ;;  %v1835_v35 = vpack.c.bf16 %v225_v50, %v222_v49  ;;  %v358_v14 = vsub.f32 %v1724_v48, %v357_v11 }
  0x4c   : > { %v1821_v38 = vpack.c.bf16 %v338_v4, %v331_v3  ;;  %v345_v10 = vand.u32 4294901760, %v344_v7  ;;  %v1349_v47 = vpack.c.bf16 %v364_v27, %v357_v11  ;;  %v365_v15 = vsub.f32 %v1734_v52, %v364_v27 }
  0x4d   : > { %1323 = vmatpush3.bf16.msra.mxu0 %v1799_v59  ;;  %1251 = vmatpush3.bf16.msra.mxu1 %v1799_v59  ;;  %v352_v39 = vand.u32 4294901760, %v351_v9  ;;  %v359_v20 = vand.u32 4294901760, %v358_v14  ;;  %v371_v32 = vand.u32 4294901760, %v1747_v57  ;;  %v378_v40 = vand.u32 4294901760, %v1752_v58 }
  0x4e   : > { %1324 = vmatprep.subr.bf16.mxu0 %v1545_v1  ;;  %1252 = vmatprep.subr.bf16.mxu1 %v1545_v1  ;;  %v366_v21 = vand.u32 4294901760, %v365_v15  ;;  %v1283_v63 = vpack.c.bf16 %v1659_v18, %v1657_v17  ;;  %v1286_v0 = vpack.c.bf16 %v1669_v24, %v1667_v23  ;;  %v1289_v3 = vpack.c.bf16 %v1681_v29, %v1671_v25 }
  0x4f   : > { %v1274_v19 = vpack.c.bf16 %v352_v39, %v345_v10  ;;  %v1352_v49 = vpack.c.bf16 %v378_v40, %v371_v32  ;;  %v372_v50 = vsub.f32 %v1747_v57, %v371_v32  ;;  %v379_v51 = vsub.f32 %v1752_v58, %v378_v40 }
  0x50   : > { %v1277_v41 = vpack.c.bf16 %v366_v21, %v359_v20  ;;  %v1292_v4 = vpack.c.bf16 %v1692_v37, %v1690_v36  ;;  %v1295_v22 = vpack.c.bf16 %v1706_v44, %v1703_v43  ;;  %v1298_v26 = vpack.c.bf16 %v1718_v46, %v1713_v45 }
  0x51   : > { %1326 = vmatpush3.bf16.msra.mxu0 %v1817_v34  ;;  %1254 = vmatpush3.bf16.msra.mxu1 %v1817_v34  ;;  %v373_v54 = vand.u32 4294901760, %v372_v50  ;;  %v380_v55 = vand.u32 4294901760, %v379_v51  ;;  %v1301_v7 = vpack.c.bf16 %v1734_v52, %v1724_v48  ;;  %v1304_v17 = vpack.c.bf16 %v1752_v58, %v1747_v57 }
  0x52   : > { %1327 = vmatprep.subr.bf16.mxu0 %v1545_v1  ;;  %1255 = vmatprep.subr.bf16.mxu1 %v1545_v1  ;;  %v155_v18 = vlaneseq }
  0x53   : > { %v1280_v61 = vpack.c.bf16 %v380_v55, %v373_v54 }
  0x54   : > { %v1865_v9 = vand.u32 127, %v155_v18 }
  0x55   : > { %1329 = vmatpush3.bf16.msra.mxu0 %v1835_v35  ;;  %1257 = vmatpush3.bf16.msra.mxu1 %v1835_v35 }
  0x56   : > { %1330 = vmatprep.subr.bf16.mxu0 %v1545_v1  ;;  %1258 = vmatprep.subr.bf16.mxu1 %v1545_v1 }
  0xba   : > { %v1867_v10 = vpop.permute.xlu0 %158 }
  0xbb   : > { %vm160_vm1 = vcmp.eq.s32.totalorder %v1867_v10, %v1865_v9 }
  0xbc   : > { %v914_v11 = vsel %vm160_vm1, 1.0, %v1547_v53 }
  0xbd   : > { %v1875_v27 = vsub.f32 %v914_v11, %v914_v11 }
  0xbf   : > { %v262_v39 = vand.u32 4294901760, %v1875_v27 }
  0xc1   : > { %1162 = vmatmul.mubr.f32.vlgmr.msra.gmra.mrb[0].mxu0 %v262_v39  ;;  %v263_v14 = vsub.f32 %v1875_v27, %v262_v39 }
  0xc2   : > { %1332 = vmatpush3.bf16.msra.mxu0 %v1757_v60  ;;  %1196 = vmatprep.mubr.msk.f32.mxu0 %vm1546_vm0, %v1547_v53  ;;  %v1548_v60 = vmov 1.0  }
  0xc3   : > { %1333 = vmatprep.subr.bf16.mxu0 %v1545_v1  ;;  %v264_v15 = vand.u32 4294901760, %v263_v14 }
  0xc5   : > { %1057 = vmatmul.mubr.f32.vlgmr.msra.gmra.mrb[0].mxu1 %v264_v15 }
  0xc6   : > { %1260 = vmatpush3.bf16.msra.mxu1 %v1778_v13  ;;  %1335 = vmatpush3.bf16.msra.mxu0 %v1766_v5 }
  0xc7   : > { %1261 = vmatprep.subr.bf16.mxu1 %v1545_v1  ;;  %1336 = vmatprep.subr.bf16.mxu0 %v1545_v1 }
  0xc8   : > { %1091 = vmatprep.mubr.msk.f32.mxu1 %vm1546_vm0, %v1547_v53 }
  0xca   : > { %1263 = vmatpush3.bf16.msra.mxu1 %v1784_v30  ;;  %1338 = vmatpush3.bf16.msra.mxu0 %v1769_v8 }
  0xcb   : > { %1264 = vmatprep.subr.bf16.mxu1 %v1545_v1  ;;  %1339 = vmatprep.subr.bf16.mxu0 %v1545_v1 }
  0xce   : > { %1266 = vmatpush3.bf16.msra.mxu1 %v1789_v33  ;;  %1341 = vmatpush3.bf16.msra.mxu0 %v1786_v31 }
  0xcf   : > { %1267 = vmatprep.subr.bf16.mxu1 %v1545_v1  ;;  %1342 = vmatprep.subr.bf16.mxu0 %v1545_v1 }
  0xd2   : > { %1269 = vmatpush3.bf16.msra.mxu1 %v1807_v2  ;;  %1344 = vmatpush3.bf16.msra.mxu0 %v1803_v62 }
  0xd3   : > { %1270 = vmatprep.subr.bf16.mxu1 %v1545_v1  ;;  %1345 = vmatprep.subr.bf16.mxu0 %v1545_v1 }
  0xd6   : > { %1272 = vmatpush3.bf16.msra.mxu1 %v1821_v38  ;;  %1347 = vmatpush3.bf16.msra.mxu0 %v1823_v6 }
  0xd7   : > { %1273 = vmatprep.subr.bf16.mxu1 %v1545_v1  ;;  %1348 = vmatprep.subr.bf16.mxu0 %v1545_v1 }
  0xda   : > { %1275 = vmatpush3.bf16.msra.mxu1 %v1274_v19  ;;  %1350 = vmatpush3.bf16.msra.mxu0 %v1349_v47 }
  0xdb   : > { %1276 = vmatprep.subr.bf16.mxu1 %v1545_v1  ;;  %1351 = vmatprep.subr.bf16.mxu0 %v1545_v1 }
  0xde   : > { %1278 = vmatpush3.bf16.msra.mxu1 %v1277_v41  ;;  %1353 = vmatpush3.bf16.msra.mxu0 %v1352_v49 }
  0xdf   : > { %1279 = vmatprep.subr.bf16.mxu1 %v1545_v1  ;;  %1354 = vmatprep.subr.bf16.mxu0 %v1545_v1 }
  0xe1   : > { %1197 = vmatmul.mubr.msk.f32.vlgmr.msra.gmra.mrb[0].mxu0 %vm160_vm1, %v1548_v60 }
  0xe2   : > { %1281 = vmatpush3.bf16.msra.mxu1 %v1280_v61  ;;  %1356 = vmatpush3.bf16.msra.mxu0 %v1655_v16 }
  0xe3   : > { %1282 = vmatprep.subr.bf16.mxu1 %v1545_v1  ;;  %1357 = vmatprep.subr.bf16.mxu0 %v1545_v1 }
  0xe4   : > { %1231 = vmatprep.mubr.msk.f32.mxu0 %vm1546_vm0, %v1547_v53 }
  0xe5   : > { %1092 = vmatmul.mubr.msk.f32.vlgmr.msra.gmra.mrb[0].mxu1 %vm160_vm1, %v1548_v60 }
  0xe6   : > { %1284 = vmatpush3.bf16.msra.mxu1 %v1283_v63  ;;  %1359 = vmatpush3.bf16.msra.mxu0 %v1679_v28 }
  0xe7   : > { %1285 = vmatprep.subr.bf16.mxu1 %v1545_v1  ;;  %1360 = vmatprep.subr.bf16.mxu0 %v1545_v1 }
  0xe8   : > { %1126 = vmatprep.mubr.msk.f32.mxu1 %vm1546_vm0, %v1547_v53 }
  0xea   : > { %1287 = vmatpush3.bf16.msra.mxu1 %v1286_v0  ;;  %1362 = vmatpush3.bf16.msra.mxu0 %v1700_v42 }
  0xeb   : > { %1288 = vmatprep.subr.bf16.mxu1 %v1545_v1  ;;  %1363 = vmatprep.subr.bf16.mxu0 %v1545_v1 }
  0xee   : > { %1290 = vmatpush3.bf16.msra.mxu1 %v1289_v3  ;;  %1365 = vmatpush3.bf16.msra.mxu0 %v1742_v56 }
  0xef   : > { %1291 = vmatprep.subr.bf16.mxu1 %v1545_v1  ;;  %1366 = vmatprep.subr.bf16.mxu0 %v1545_v1 }
  0xf2   : > { %1293 = vmatpush3.bf16.msra.mxu1 %v1292_v4  ;;  %1368 = vmatpush3.bf16.msra.mxu0 %v1776_v12 }
  0xf3   : > { %1294 = vmatprep.subr.bf16.mxu1 %v1545_v1  ;;  %1369 = vmatprep.subr.bf16.mxu0 %v1545_v1 }
  0xf6   : > { %1296 = vmatpush3.bf16.msra.mxu1 %v1295_v22  ;;  %1371 = vmatpush3.bf16.msra.mxu0 %v1799_v59 }
  0xf7   : > { %1297 = vmatprep.subr.bf16.mxu1 %v1545_v1  ;;  %1372 = vmatprep.subr.bf16.mxu0 %v1545_v1 }
  0xfa   : > { %1299 = vmatpush3.bf16.msra.mxu1 %v1298_v26  ;;  %1374 = vmatpush3.bf16.msra.mxu0 %v1817_v34 }
  0xfb   : > { %1300 = vmatprep.subr.bf16.mxu1 %v1545_v1  ;;  %1375 = vmatprep.subr.bf16.mxu0 %v1545_v1 }
  0xfe   : > { %1302 = vmatpush3.bf16.msra.mxu1 %v1301_v7  ;;  %1377 = vmatpush3.bf16.msra.mxu0 %v1835_v35 }
  0xff   : > { %1303 = vmatprep.subr.bf16.mxu1 %v1545_v1 }
 0x101   : > { %1232 = vmatmul.mubr.msk.f32.vlgmr.msra.gmra.mrb[0].mxu0 %vm160_vm1, %v1548_v60 }
 0x102   : > { %1305 = vmatpush3.bf16.msra.mxu1 %v1304_v17 }
 0x105   : > { %1127 = vmatmul.mubr.f32.vlgmr.msra.gmra.mrb[0].mxu1 %v1875_v27 }
 0x1d4   : > { %v816_v16 = vpop.f32.mrb[0].mxu0 }
 0x1d5   : > { %v1233_v23 = vpop.f32.mrb[1].mxu0 }
 0x1d8   : > { %v521_v24 = vpop.f32.mrb[0].mxu1 }
 0x1d9   : > { %v1378_v1 = vadd.f32 %v816_v16, %v521_v24  ;;  %v1128_v25 = vpop.f32.mrb[1].mxu1 }
 0x1db   : > { %820 = vst [vmem:[%s149_s26] sm:$0xff] %v1378_v1 }
 0x1dc   : > { %1486 = shalt.err (!%p1483_p7)
}
 0x1dd   : > { %s1487_s7 = scalar_lea.hbm %s1972_s30, 128  ;;  %s1491_s16 = scalar_lea.hbm %s2016_s2, 256 }
 0x1de   : > { %p1488_p8 = scmp.ne.s32.totalorder %s1972_s30, %s1487_s7  ;;  %p1492_p1 = scmp.lt.u32.totalorder %s1972_s30, %s2016_s2 }
 0x1df   : > { %p1493_p0 = scmp.lt.u32.totalorder %s1491_s16, %s1487_s7  ;;  %p1495_p6 = scmp.lt.u32.totalorder %s1487_s7, %s1972_s30 }
 0x1e0   : > { %p1489_p11 = pnand %p1488_p8, %p2027_p9 }
 0x1e1   : > { %p1494_p5 = por %p1493_p0, %p1492_p1 }
 0x1e2   : > { %p1490_p13 = pneg %p1489_p11 }
 0x1e3   : > { %p1496_p10 = por %p1495_p6, %p1494_p5 }
 0x1e5   : > { %p1497_p12 = pnand %p1496_p10, %p1490_p13 }
 0x1e7   : > { %1500 = shalt.err (!%p1497_p12)
}
 0x1e8   : > { %1391 = dma.vmem_to_hbm [thread:$0]  (%p2027_p9), %s1974_s27, 128, %s1972_s30, %s822_s3  }
 0x1e9 PF: > { %p1403_p2 = scmp.ge.s32.totalorder %s1539_s12, 2  ;;  %s847_s22 = sand.u32 1, %s1527_s9  }
 0x1ea   : > { %p2028_p3 = scmp.ne.s32.totalorder %s2021_s20, 0  ;;  %s848_s23 = scalar_lea.sflag [#allocation4], %s847_s22 }
 0x1ec   : > { %p1398_p4 = pnand %p1403_p2, %p2028_p3 }
 0x1ee   : > { %1522 = dma.done.wait (!%p1398_p4), %s848_s23, 128  }
 0x1ef   : > { %1524 = vsyncadd (!%p1398_p4), %s848_s23, 4294967168  ;;  %p13_p7 = scmp.ge.s32.totalorder %s1590_s15, 4   ;;  %s2029_s9 = smov %s1531_s10 }
 0x1f0   : > { %s2030_s10 = smov %s1535_s11  ;;  %s2031_s11 = smov %s1601_s18 }
 0x1f1   : > { %s2032_s12 = smov %s1590_s15  ;;  %15 = sbr.rel (!%p13_p7) target bundleno = 4 (0x4), region = 68 }
 0x1f8   :  { %853 = vsyncpa [#allocation3], 1 }
 0x1f9   :  { %855 = vsyncpa [#allocation3 + $0x1], 1 }
 0x1fa   :  { %856 = vsyncpa [#allocation4], 1 }
 0x1fb   :  { %858 = vsyncpa [#allocation4 + $0x1], 1 }

</bundles_post_ra>
